<compile_context>
chip_gen: v6e
topology: v6e:2x2x1
jax: 0.10.0
libtpu: 0.0.40
codegen_flags: <defaults>
</compile_context>

<pallas_src>
import functools

import jax
import jax.numpy as jnp
from jax.experimental import pallas as pl
from jax.experimental.pallas import tpu as pltpu

_IGNORE_INDEX = -100       # PyTorch nn.CrossEntropyLoss default
_SUBLANE = 8
_LANE = 128


def _round_up(x, m):
    return ((x + m - 1) // m) * m


def _vmem_capacity_bytes():
    """Best-effort per-core VMEM query; conservative fallback (v7x per-TC)."""
    try:
        info = pltpu.get_tpu_info()
        for attr in ("vmem_capacity_bytes", "vmem_size_bytes", "vmem_bytes"):
            v = getattr(info, attr, None)
            if v:
                return int(v)
    except Exception:
        pass
    return 64 * 1024 * 1024


def _choose_tiles(batch, num_classes, itemsize, block_b, block_c):
    """Pick (tb, tc).  Constraints:
       tb % 8 == 0 and tb <= batch, OR tb == batch;
       tc % 128 == 0 and tc <= C,   OR tc == C."""
    vmem = _vmem_capacity_bytes()
    # 2 logits inputs x 2 pipeline buffers per tile must stay well inside the
    # per-core VMEM on every generation (v5e/v6e: 128 MiB, v7x: 64 MiB/TC).
    tile_budget = max(1 << 20, min(8 << 20, vmem // 8))

    # --- class tile -------------------------------------------------------
    if block_c is not None:
        tc = block_c
    elif _SUBLANE * num_classes * itemsize <= tile_budget:
        tc = num_classes                       # whole class axis in one chunk
    else:
        # vocab-scale C: chunk the class axis (online logsumexp in the kernel)
        tc = max(_LANE, (tile_budget // (_SUBLANE * itemsize)) // _LANE * _LANE)
        tc = min(tc, (num_classes // _LANE) * _LANE)

    bytes_per_row = tc * itemsize

    # --- batch tile -------------------------------------------------------
    if block_b is not None:
        tb = block_b
    elif batch <= _SUBLANE:
        tb = batch                             # full-dim block (layout rule ok)
    else:
        tb_max = (batch // _SUBLANE) * _SUBLANE            # largest mult-of-8 <= B
        tb_cap = max(_SUBLANE,
                     min(1024, (tile_budget // max(bytes_per_row, 1))
                         // _SUBLANE * _SUBLANE))          # VMEM budget + scratch bound
        tb_half = _round_up(pl.cdiv(batch, 2), _SUBLANE)   # >=2 tiles (v7x megacore)
        tb = min(tb_max, tb_cap, tb_half)

    vmem_limit = int(min(vmem * 3 // 4, 48 << 20))
    return tb, tc, vmem_limit


def _mix_aux_ce_kernel(tgt_ref, o0_ref, o1_ref, out_ref,
                       m0_ref, s0_ref, g0_ref, m1_ref, s1_ref, g1_ref,
                       *, total_b, num_classes, ignore_index):
    """Grid = (batch tiles [parallel], class chunks [arbitrary]).

    Per batch tile, accumulate an online logsumexp over the class chunks, then
    emit a lane-dense (1, 8, 128) block of partial sums on the last chunk.
    """
    bi = pl.program_id(0)
    ci = pl.program_id(1)
    num_ci = pl.num_programs(1)
    tb, tc = o0_ref.shape
    mask_cols = (num_classes % tc) != 0        # static Python bool

    @pl.when(ci == 0)
    def _():
        neg_inf = jnp.full((tb, 1), -jnp.inf, jnp.float32)
        zeros = jnp.zeros((tb, 1), jnp.float32)
        m0_ref[...] = neg_inf
        m1_ref[...] = neg_inf
        s0_ref[...] = zeros
        s1_ref[...] = zeros
        g0_ref[...] = zeros
        g1_ref[...] = zeros

    tgt = tgt_ref[...]                         # (tb, 1) int32

    def accumulate(logits_ref, m_ref, s_ref, g_ref):
        # Rebuilt per head (cheap VPU work hidden under the HBM-bound DMA)
        # instead of sharing a materialized (tb, tc) mask across both heads.
        x = logits_ref[...].astype(jnp.float32)                       # (tb, tc)
        class_ids = jax.lax.broadcasted_iota(jnp.int32, (tb, tc), 1) + ci * tc
        if mask_cols:                           # ragged last class chunk
            x = jnp.where(class_ids < num_classes, x, -jnp.inf)
        tgt_mask = class_ids == tgt                                    # bool

        m_old = m_ref[...]
        m_new = jnp.maximum(m_old, jnp.max(x, axis=-1, keepdims=True))
        s_ref[...] = (jnp.exp(m_old - m_new) * s_ref[...]
                      + jnp.sum(jnp.exp(x - m_new), axis=-1, keepdims=True))
        g_ref[...] = g_ref[...] + jnp.sum(jnp.where(tgt_mask, x, 0.0),
                                          axis=-1, keepdims=True)
        m_ref[...] = m_new

    accumulate(o0_ref, m0_ref, s0_ref, g0_ref)
    accumulate(o1_ref, m1_ref, s1_ref, g1_ref)

    @pl.when(ci == num_ci - 1)
    def _():
        # Row validity: inside the real batch (ragged last batch block reads
        # stale VMEM, killed here) and not the ignore sentinel.
        row_ids = jax.lax.broadcasted_iota(jnp.int32, (tb, 1), 0) + bi * tb
        valid = (row_ids < total_b) & (tgt != ignore_index)

        def reduce(m_ref, s_ref, g_ref):
            per_row = m_ref[...] + jnp.log(s_ref[...]) - g_ref[...]
            return jnp.sum(jnp.where(valid, per_row, 0.0))

        loss0 = reduce(m0_ref, s0_ref, g0_ref)
        loss1 = reduce(m1_ref, s1_ref, g1_ref)
        count = jnp.sum(valid.astype(jnp.float32))

        # Lane-dense (8, 128) block: sublane 0 -> loss0, 1 -> loss1, 2 -> count.
        sub = jax.lax.broadcasted_iota(jnp.int32, (8, 128), 0)
        out_ref[0] = jnp.where(sub == 0, loss0,
                               jnp.where(sub == 1, loss1, count))


def mix_auxiliary_loss(outputs, targets, *, aux_weight,
                       ignore_index=_IGNORE_INDEX, block_b=None, block_c=None):
    """Pallas implementation of MixAuxiliaryLoss.forward (CrossEntropy base).

    outputs: tuple/list of exactly 2 logits arrays, each (B, C) (f32 or bf16)
    targets: int array (B,) of class indices (ignore_index rows are skipped)
    """
    if len(outputs) != 2:
        raise Exception('outputs length must be 2')

    o0, o1 = outputs
    b, c = o0.shape
    tgt = targets.astype(jnp.int32).reshape(b, 1)

    tb, tc, vmem_limit = _choose_tiles(b, c, o0.dtype.itemsize, block_b, block_c)
    nb = pl.cdiv(b, tb)
    nc = pl.cdiv(c, tc)

    kernel = functools.partial(_mix_aux_ce_kernel,
                               total_b=b, num_classes=c,
                               ignore_index=ignore_index)

    partials = pl.pallas_call(
        kernel,
        out_shape=jax.ShapeDtypeStruct((nb, 8, 128), jnp.float32),
        grid=(nb, nc),
        in_specs=[
            pl.BlockSpec((tb, 1), lambda bi, ci: (bi, 0)),    # targets
            pl.BlockSpec((tb, tc), lambda bi, ci: (bi, ci)),  # logits head 0
            pl.BlockSpec((tb, tc), lambda bi, ci: (bi, ci)),  # logits head 1
        ],
        out_specs=pl.BlockSpec((1, 8, 128), lambda bi, ci: (bi, 0, 0)),
        scratch_shapes=[pltpu.VMEM((tb, 1), jnp.float32)] * 6,
        compiler_params=pltpu.CompilerParams(
            dimension_semantics=("parallel", "arbitrary"),
            vmem_limit_bytes=vmem_limit,
        ),
    )(tgt, o0, o1)

    loss0_sum = jnp.sum(partials[:, 0, 0])
    loss1_sum = jnp.sum(partials[:, 1, 0])
    # NOTE: PyTorch returns NaN when ALL targets are ignored; we return 0.0.
    count = jnp.maximum(jnp.sum(partials[:, 2, 0]), 1.0)
    return loss0_sum / count + jnp.float32(aux_weight) * (loss1_sum / count)


def _reference(outputs, targets, aux_weight, ignore_index=_IGNORE_INDEX):
    """Pure-JAX reference (CrossEntropy with ignore_index, mean reduction)."""
    def ce(logits, t):
        x = logits.astype(jnp.float32)
        lse = jax.nn.logsumexp(x, axis=-1)
        safe_t = jnp.where(t == ignore_index, 0, t).astype(jnp.int32)
        tl = jnp.take_along_axis(x, safe_t[:, None], axis=-1)[:, 0]
        valid = (t != ignore_index)
        num = jnp.sum(jnp.where(valid, lse - tl, 0.0))
        den = jnp.maximum(jnp.sum(valid.astype(jnp.float32)), 1.0)
        return num / den
    return ce(outputs[0], targets) + aux_weight * ce(outputs[1], targets)


if __name__ == "__main__":
    aux_weight = 0.4

    def check(key, B, C, dtype=jnp.float32, block_b=None, block_c=None,
              with_ignore=False, tol=1e-5):
        k0, k1, k2 = jax.random.split(key, 3)
        l0 = jax.random.normal(k0, (B, C), dtype=jnp.float32).astype(dtype)
        l1 = jax.random.normal(k1, (B, C), dtype=jnp.float32).astype(dtype)
        t = jax.random.randint(k2, (B,), 0, C, dtype=jnp.int32)
        if with_ignore:
            t = t.at[::5].set(_IGNORE_INDEX)
        out = jax.block_until_ready(
            mix_auxiliary_loss((l0, l1), t, aux_weight=aux_weight,
                               block_b=block_b, block_c=block_c))
        ref = _reference((l0, l1), t, aux_weight)
        assert jnp.allclose(out, ref, rtol=tol, atol=tol), (B, C, dtype, out, ref)

    keys = jax.random.split(jax.random.PRNGKey(0), 5)
    # 1) small f32, single tile
    check(keys[0], 8, 32)
    # 2) multi-tile grid with ragged last batch block (40 = 16+16+8, NO padding)
    check(keys[1], 40, 256, block_b=16)
    # 3) bf16 logits (halved DMA traffic, f32 math in-kernel)
    check(keys[2], 8, 32, dtype=jnp.bfloat16)
    # 4) class-chunked online-logsumexp path with ragged last class chunk
    check(keys[3], 16, 320, block_b=8, block_c=128)
    # 5) ignore_index rows excluded from numerator and divisor
    check(keys[4], 24, 64, block_b=8, with_ignore=True)

    print("KERNEL_OK")
</pallas_src>

<mosaic_0001>
module attributes {stable_mosaic.version = 11 : i64} {
  func.func @_mix_aux_ce_kernel(%arg0: i32, %arg1: i32, %arg2: memref<8x1xi32, #tpu.memory_space<vmem>>, %arg3: memref<8x32xf32, #tpu.memory_space<vmem>>, %arg4: memref<8x32xf32, #tpu.memory_space<vmem>>, %arg5: memref<1x8x128xf32, #tpu.memory_space<vmem>>, %arg6: memref<8x1xf32, #tpu.memory_space<vmem>>, %arg7: memref<8x1xf32, #tpu.memory_space<vmem>>, %arg8: memref<8x1xf32, #tpu.memory_space<vmem>>, %arg9: memref<8x1xf32, #tpu.memory_space<vmem>>, %arg10: memref<8x1xf32, #tpu.memory_space<vmem>>, %arg11: memref<8x1xf32, #tpu.memory_space<vmem>>) attributes {dimension_semantics = [#tpu.dimension_semantics<parallel>, #tpu.dimension_semantics<arbitrary>], iteration_bounds = array<i64: 1, 1>, scalar_prefetch = 0 : i64, scratch_operands = 6 : i64, tpu.core_type = #tpu.core_type<tc>, window_params = [{transform_indices = @transform_0, window_bounds = array<i64: 8, 1>}, {transform_indices = @transform_1, window_bounds = array<i64: 8, 32>}, {transform_indices = @transform_2, window_bounds = array<i64: 8, 32>}, {transform_indices = @transform_3, window_bounds = array<i64: 1, 8, 128>}]} {
    %c0_i32 = arith.constant 0 : i32
    %0 = arith.cmpi eq, %arg1, %c0_i32 : i32
    %1 = arith.extui %0 : i1 to i32
    %c0_i32_0 = arith.constant 0 : i32
    %2 = arith.cmpi ne, %1, %c0_i32_0 : i32
    scf.if %2 {
      %cst_40 = arith.constant 0xFF800000 : f32
      %67 = vector.broadcast %cst_40 : f32 to vector<8x1xf32>
      %cst_41 = arith.constant 0.000000e+00 : f32
      %68 = vector.broadcast %cst_41 : f32 to vector<8x1xf32>
      %c0_42 = arith.constant 0 : index
      %c0_43 = arith.constant 0 : index
      %69 = vector.load %arg6[%c0_42, %c0_43] : memref<8x1xf32, #tpu.memory_space<vmem>>, vector<8x1xf32>
      tpu.vector_store %arg6[%c0_42, %c0_43], %67 {strides = array<i32>} : memref<8x1xf32, #tpu.memory_space<vmem>>, vector<8x1xf32>,
      %c0_44 = arith.constant 0 : index
      %c0_45 = arith.constant 0 : index
      %70 = vector.load %arg9[%c0_44, %c0_45] : memref<8x1xf32, #tpu.memory_space<vmem>>, vector<8x1xf32>
      tpu.vector_store %arg9[%c0_44, %c0_45], %67 {strides = array<i32>} : memref<8x1xf32, #tpu.memory_space<vmem>>, vector<8x1xf32>,
      %c0_46 = arith.constant 0 : index
      %c0_47 = arith.constant 0 : index
      %71 = vector.load %arg7[%c0_46, %c0_47] : memref<8x1xf32, #tpu.memory_space<vmem>>, vector<8x1xf32>
      tpu.vector_store %arg7[%c0_46, %c0_47], %68 {strides = array<i32>} : memref<8x1xf32, #tpu.memory_space<vmem>>, vector<8x1xf32>,
      %c0_48 = arith.constant 0 : index
      %c0_49 = arith.constant 0 : index
      %72 = vector.load %arg10[%c0_48, %c0_49] : memref<8x1xf32, #tpu.memory_space<vmem>>, vector<8x1xf32>
      tpu.vector_store %arg10[%c0_48, %c0_49], %68 {strides = array<i32>} : memref<8x1xf32, #tpu.memory_space<vmem>>, vector<8x1xf32>,
      %c0_50 = arith.constant 0 : index
      %c0_51 = arith.constant 0 : index
      %73 = vector.load %arg8[%c0_50, %c0_51] : memref<8x1xf32, #tpu.memory_space<vmem>>, vector<8x1xf32>
      tpu.vector_store %arg8[%c0_50, %c0_51], %68 {strides = array<i32>} : memref<8x1xf32, #tpu.memory_space<vmem>>, vector<8x1xf32>,
      %c0_52 = arith.constant 0 : index
      %c0_53 = arith.constant 0 : index
      %74 = vector.load %arg11[%c0_52, %c0_53] : memref<8x1xf32, #tpu.memory_space<vmem>>, vector<8x1xf32>
      tpu.vector_store %arg11[%c0_52, %c0_53], %68 {strides = array<i32>} : memref<8x1xf32, #tpu.memory_space<vmem>>, vector<8x1xf32>,
    } else {
    }
    %c0 = arith.constant 0 : index
    %c0_1 = arith.constant 0 : index
    %3 = vector.load %arg2[%c0, %c0_1] : memref<8x1xi32, #tpu.memory_space<vmem>>, vector<8x1xi32>
    %c0_2 = arith.constant 0 : index
    %c0_3 = arith.constant 0 : index
    %4 = vector.load %arg3[%c0_2, %c0_3] : memref<8x32xf32, #tpu.memory_space<vmem>>, vector<8x32xf32>
    %5 = tpu.iota {dimensions = array<i32: 1>} : vector<8x32xi32>
    %c32_i32 = arith.constant 32 : i32
    %6 = arith.muli %arg1, %c32_i32 : i32
    %7 = vector.broadcast %6 : i32 to vector<8x32xi32>
    %8 = arith.addi %5, %7 : vector<8x32xi32>
    %9 = vector.broadcast %3 : vector<8x1xi32> to vector<8x32xi32>
    %10 = arith.cmpi eq, %8, %9 : vector<8x32xi32>
    %c0_4 = arith.constant 0 : index
    %c0_5 = arith.constant 0 : index
    %11 = vector.load %arg6[%c0_4, %c0_5] : memref<8x1xf32, #tpu.memory_space<vmem>>, vector<8x1xf32>
    %cst = arith.constant dense<0xFF800000> : vector<8xf32>
    %12 = vector.multi_reduction <maximumf>, %4, %cst [1] : vector<8x32xf32> to vector<8xf32>
    %13 = vector.shape_cast %12 : vector<8xf32> to vector<8x1xf32>
    %14 = arith.maximumf %11, %13 : vector<8x1xf32>
    %15 = arith.subf %11, %14 : vector<8x1xf32>
    %16 = math.exp %15 : vector<8x1xf32>
    %c0_6 = arith.constant 0 : index
    %c0_7 = arith.constant 0 : index
    %17 = vector.load %arg7[%c0_6, %c0_7] : memref<8x1xf32, #tpu.memory_space<vmem>>, vector<8x1xf32>
    %18 = arith.mulf %16, %17 : vector<8x1xf32>
    %19 = vector.broadcast %14 : vector<8x1xf32> to vector<8x32xf32>
    %20 = arith.subf %4, %19 : vector<8x32xf32>
    %21 = math.exp %20 : vector<8x32xf32>
    %cst_8 = arith.constant dense<0.000000e+00> : vector<8xf32>
    %22 = vector.multi_reduction <add>, %21, %cst_8 [1] : vector<8x32xf32> to vector<8xf32>
    %23 = vector.shape_cast %22 : vector<8xf32> to vector<8x1xf32>
    %24 = arith.addf %18, %23 : vector<8x1xf32>
    %c0_9 = arith.constant 0 : index
    %c0_10 = arith.constant 0 : index
    %25 = vector.load %arg7[%c0_9, %c0_10] : memref<8x1xf32, #tpu.memory_space<vmem>>, vector<8x1xf32>
    tpu.vector_store %arg7[%c0_9, %c0_10], %24 {strides = array<i32>} : memref<8x1xf32, #tpu.memory_space<vmem>>, vector<8x1xf32>,
    %c0_11 = arith.constant 0 : index
    %c0_12 = arith.constant 0 : index
    %26 = vector.load %arg8[%c0_11, %c0_12] : memref<8x1xf32, #tpu.memory_space<vmem>>, vector<8x1xf32>
    %cst_13 = arith.constant 0.000000e+00 : f32
    %27 = vector.broadcast %cst_13 : f32 to vector<8x32xf32>
    %28 = arith.select %10, %4, %27 : vector<8x32xi1>, vector<8x32xf32>
    %cst_14 = arith.constant dense<0.000000e+00> : vector<8xf32>
    %29 = vector.multi_reduction <add>, %28, %cst_14 [1] : vector<8x32xf32> to vector<8xf32>
    %30 = vector.shape_cast %29 : vector<8xf32> to vector<8x1xf32>
    %31 = arith.addf %26, %30 : vector<8x1xf32>
    %c0_15 = arith.constant 0 : index
    %c0_16 = arith.constant 0 : index
    %32 = vector.load %arg8[%c0_15, %c0_16] : memref<8x1xf32, #tpu.memory_space<vmem>>, vector<8x1xf32>
    tpu.vector_store %arg8[%c0_15, %c0_16], %31 {strides = array<i32>} : memref<8x1xf32, #tpu.memory_space<vmem>>, vector<8x1xf32>,
    %c0_17 = arith.constant 0 : index
    %c0_18 = arith.constant 0 : index
    %33 = vector.load %arg6[%c0_17, %c0_18] : memref<8x1xf32, #tpu.memory_space<vmem>>, vector<8x1xf32>
    tpu.vector_store %arg6[%c0_17, %c0_18], %14 {strides = array<i32>} : memref<8x1xf32, #tpu.memory_space<vmem>>, vector<8x1xf32>,
    %c0_19 = arith.constant 0 : index
    %c0_20 = arith.constant 0 : index
    %34 = vector.load %arg4[%c0_19, %c0_20] : memref<8x32xf32, #tpu.memory_space<vmem>>, vector<8x32xf32>
    %35 = tpu.iota {dimensions = array<i32: 1>} : vector<8x32xi32>
    %c32_i32_21 = arith.constant 32 : i32
    %36 = arith.muli %arg1, %c32_i32_21 : i32
    %37 = vector.broadcast %36 : i32 to vector<8x32xi32>
    %38 = arith.addi %35, %37 : vector<8x32xi32>
    %39 = vector.broadcast %3 : vector<8x1xi32> to vector<8x32xi32>
    %40 = arith.cmpi eq, %38, %39 : vector<8x32xi32>
    %c0_22 = arith.constant 0 : index
    %c0_23 = arith.constant 0 : index
    %41 = vector.load %arg9[%c0_22, %c0_23] : memref<8x1xf32, #tpu.memory_space<vmem>>, vector<8x1xf32>
    %cst_24 = arith.constant dense<0xFF800000> : vector<8xf32>
    %42 = vector.multi_reduction <maximumf>, %34, %cst_24 [1] : vector<8x32xf32> to vector<8xf32>
    %43 = vector.shape_cast %42 : vector<8xf32> to vector<8x1xf32>
    %44 = arith.maximumf %41, %43 : vector<8x1xf32>
    %45 = arith.subf %41, %44 : vector<8x1xf32>
    %46 = math.exp %45 : vector<8x1xf32>
    %c0_25 = arith.constant 0 : index
    %c0_26 = arith.constant 0 : index
    %47 = vector.load %arg10[%c0_25, %c0_26] : memref<8x1xf32, #tpu.memory_space<vmem>>, vector<8x1xf32>
    %48 = arith.mulf %46, %47 : vector<8x1xf32>
    %49 = vector.broadcast %44 : vector<8x1xf32> to vector<8x32xf32>
    %50 = arith.subf %34, %49 : vector<8x32xf32>
    %51 = math.exp %50 : vector<8x32xf32>
    %cst_27 = arith.constant dense<0.000000e+00> : vector<8xf32>
    %52 = vector.multi_reduction <add>, %51, %cst_27 [1] : vector<8x32xf32> to vector<8xf32>
    %53 = vector.shape_cast %52 : vector<8xf32> to vector<8x1xf32>
    %54 = arith.addf %48, %53 : vector<8x1xf32>
    %c0_28 = arith.constant 0 : index
    %c0_29 = arith.constant 0 : index
    %55 = vector.load %arg10[%c0_28, %c0_29] : memref<8x1xf32, #tpu.memory_space<vmem>>, vector<8x1xf32>
    tpu.vector_store %arg10[%c0_28, %c0_29], %54 {strides = array<i32>} : memref<8x1xf32, #tpu.memory_space<vmem>>, vector<8x1xf32>,
    %c0_30 = arith.constant 0 : index
    %c0_31 = arith.constant 0 : index
    %56 = vector.load %arg11[%c0_30, %c0_31] : memref<8x1xf32, #tpu.memory_space<vmem>>, vector<8x1xf32>
    %cst_32 = arith.constant 0.000000e+00 : f32
    %57 = vector.broadcast %cst_32 : f32 to vector<8x32xf32>
    %58 = arith.select %40, %34, %57 : vector<8x32xi1>, vector<8x32xf32>
    %cst_33 = arith.constant dense<0.000000e+00> : vector<8xf32>
    %59 = vector.multi_reduction <add>, %58, %cst_33 [1] : vector<8x32xf32> to vector<8xf32>
    %60 = vector.shape_cast %59 : vector<8xf32> to vector<8x1xf32>
    %61 = arith.addf %56, %60 : vector<8x1xf32>
    %c0_34 = arith.constant 0 : index
    %c0_35 = arith.constant 0 : index
    %62 = vector.load %arg11[%c0_34, %c0_35] : memref<8x1xf32, #tpu.memory_space<vmem>>, vector<8x1xf32>
    tpu.vector_store %arg11[%c0_34, %c0_35], %61 {strides = array<i32>} : memref<8x1xf32, #tpu.memory_space<vmem>>, vector<8x1xf32>,
    %c0_36 = arith.constant 0 : index
    %c0_37 = arith.constant 0 : index
    %63 = vector.load %arg9[%c0_36, %c0_37] : memref<8x1xf32, #tpu.memory_space<vmem>>, vector<8x1xf32>
    tpu.vector_store %arg9[%c0_36, %c0_37], %44 {strides = array<i32>} : memref<8x1xf32, #tpu.memory_space<vmem>>, vector<8x1xf32>,
    %c0_i32_38 = arith.constant 0 : i32
    %64 = arith.cmpi eq, %arg1, %c0_i32_38 : i32
    %65 = arith.extui %64 : i1 to i32
    %c0_i32_39 = arith.constant 0 : i32
    %66 = arith.cmpi ne, %65, %c0_i32_39 : i32
    scf.if %66 {
      %67 = tpu.iota {dimensions = array<i32: 0>} : vector<8x1xi32>
      %c8_i32 = arith.constant 8 : i32
      %68 = arith.muli %arg0, %c8_i32 : i32
      %69 = vector.broadcast %68 : i32 to vector<8x1xi32>
      %70 = arith.addi %67, %69 : vector<8x1xi32>
      %c8_i32_40 = arith.constant 8 : i32
      %71 = vector.broadcast %c8_i32_40 : i32 to vector<8x1xi32>
      %72 = arith.cmpi slt, %70, %71 : vector<8x1xi32>
      %c-100_i32 = arith.constant -100 : i32
      %73 = vector.broadcast %c-100_i32 : i32 to vector<8x1xi32>
      %74 = arith.cmpi ne, %3, %73 : vector<8x1xi32>
      %75 = arith.andi %72, %74 : vector<8x1xi1>
      %c0_41 = arith.constant 0 : index
      %c0_42 = arith.constant 0 : index
      %76 = vector.load %arg6[%c0_41, %c0_42] : memref<8x1xf32, #tpu.memory_space<vmem>>, vector<8x1xf32>
      %c0_43 = arith.constant 0 : index
      %c0_44 = arith.constant 0 : index
      %77 = vector.load %arg7[%c0_43, %c0_44] : memref<8x1xf32, #tpu.memory_space<vmem>>, vector<8x1xf32>
      %78 = math.log %77 : vector<8x1xf32>
      %79 = arith.addf %76, %78 : vector<8x1xf32>
      %c0_45 = arith.constant 0 : index
      %c0_46 = arith.constant 0 : index
      %80 = vector.load %arg8[%c0_45, %c0_46] : memref<8x1xf32, #tpu.memory_space<vmem>>, vector<8x1xf32>
      %81 = arith.subf %79, %80 : vector<8x1xf32>
      %cst_47 = arith.constant 0.000000e+00 : f32
      %82 = vector.broadcast %cst_47 : f32 to vector<8x1xf32>
      %83 = arith.select %75, %81, %82 : vector<8x1xi1>, vector<8x1xf32>
      %84 = vector.shape_cast %83 : vector<8x1xf32> to vector<1x8x1xf32>
      %cst_48 = arith.constant dense<0.000000e+00> : vector<1xf32>
      %85 = vector.multi_reduction <add>, %84, %cst_48 [1, 2] : vector<1x8x1xf32> to vector<1xf32>
      %86 = vector.shape_cast %85 : vector<1xf32> to vector<1x1x1xf32>
      %87 = vector.extract %86[0, 0, 0] : f32 from vector<1x1x1xf32>
      %c0_49 = arith.constant 0 : index
      %c0_50 = arith.constant 0 : index
      %88 = vector.load %arg9[%c0_49, %c0_50] : memref<8x1xf32, #tpu.memory_space<vmem>>, vector<8x1xf32>
      %c0_51 = arith.constant 0 : index
      %c0_52 = arith.constant 0 : index
      %89 = vector.load %arg10[%c0_51, %c0_52] : memref<8x1xf32, #tpu.memory_space<vmem>>, vector<8x1xf32>
      %90 = math.log %89 : vector<8x1xf32>
      %91 = arith.addf %88, %90 : vector<8x1xf32>
      %c0_53 = arith.constant 0 : index
      %c0_54 = arith.constant 0 : index
      %92 = vector.load %arg11[%c0_53, %c0_54] : memref<8x1xf32, #tpu.memory_space<vmem>>, vector<8x1xf32>
      %93 = arith.subf %91, %92 : vector<8x1xf32>
      %cst_55 = arith.constant 0.000000e+00 : f32
      %94 = vector.broadcast %cst_55 : f32 to vector<8x1xf32>
      %95 = arith.select %75, %93, %94 : vector<8x1xi1>, vector<8x1xf32>
      %96 = vector.shape_cast %95 : vector<8x1xf32> to vector<1x8x1xf32>
      %cst_56 = arith.constant dense<0.000000e+00> : vector<1xf32>
      %97 = vector.multi_reduction <add>, %96, %cst_56 [1, 2] : vector<1x8x1xf32> to vector<1xf32>
      %98 = vector.shape_cast %97 : vector<1xf32> to vector<1x1x1xf32>
      %99 = vector.extract %98[0, 0, 0] : f32 from vector<1x1x1xf32>
      %100 = arith.extui %75 : vector<8x1xi1> to vector<8x1xi32>
      %101 = arith.sitofp %100 : vector<8x1xi32> to vector<8x1xf32>
      %102 = vector.shape_cast %101 : vector<8x1xf32> to vector<1x8x1xf32>
      %cst_57 = arith.constant dense<0.000000e+00> : vector<1xf32>
      %103 = vector.multi_reduction <add>, %102, %cst_57 [1, 2] : vector<1x8x1xf32> to vector<1xf32>
      %104 = vector.shape_cast %103 : vector<1xf32> to vector<1x1x1xf32>
      %105 = vector.extract %104[0, 0, 0] : f32 from vector<1x1x1xf32>
      %106 = tpu.iota {dimensions = array<i32: 0>} : vector<8x128xi32>
      %c0_i32_58 = arith.constant 0 : i32
      %107 = vector.broadcast %c0_i32_58 : i32 to vector<8x128xi32>
      %108 = arith.cmpi eq, %106, %107 : vector<8x128xi32>
      %c1_i32 = arith.constant 1 : i32
      %109 = vector.broadcast %c1_i32 : i32 to vector<8x128xi32>
      %110 = arith.cmpi eq, %106, %109 : vector<8x128xi32>
      %111 = vector.broadcast %99 : f32 to vector<8x128xf32>
      %112 = vector.broadcast %105 : f32 to vector<8x128xf32>
      %113 = arith.select %110, %111, %112 : vector<8x128xi1>, vector<8x128xf32>
      %114 = vector.broadcast %87 : f32 to vector<8x128xf32>
      %115 = arith.select %108, %114, %113 : vector<8x128xi1>, vector<8x128xf32>
      %c0_59 = arith.constant 0 : index
      %c0_60 = arith.constant 0 : index
      %c0_61 = arith.constant 0 : index
      %116 = vector.load %arg5[%c0_59, %c0_60, %c0_61] : memref<1x8x128xf32, #tpu.memory_space<vmem>>, vector<1x8x128xf32>
      %117 = vector.shape_cast %116 : vector<1x8x128xf32> to vector<8x128xf32>
      %118 = vector.shape_cast %115 : vector<8x128xf32> to vector<1x8x128xf32>
      tpu.vector_store %arg5[%c0_59, %c0_60, %c0_61], %118 {strides = array<i32>} : memref<1x8x128xf32, #tpu.memory_space<vmem>>, vector<1x8x128xf32>,
    } else {
    }
    return
  }
  func.func @transform_0(%arg0: i32, %arg1: i32) -> (i32, i32) {
    %c0_i32 = arith.constant 0 : i32
    %c0_i32_0 = arith.constant 0 : i32
    return %arg0, %c0_i32 : i32, i32
  }
  func.func @transform_1(%arg0: i32, %arg1: i32) -> (i32, i32) {
    %c0_i32 = arith.constant 0 : i32
    return %arg0, %arg1 : i32, i32
  }
  func.func @transform_2(%arg0: i32, %arg1: i32) -> (i32, i32) {
    %c0_i32 = arith.constant 0 : i32
    return %arg0, %arg1 : i32, i32
  }
  func.func @transform_3(%arg0: i32, %arg1: i32) -> (i32, i32, i32) {
    %c0_i32 = arith.constant 0 : i32
    %c0_i32_0 = arith.constant 0 : i32
    %c0_i32_1 = arith.constant 0 : i32
    return %arg0, %c0_i32, %c0_i32_0 : i32, i32, i32
  }
}

</mosaic_0001>

<bundles_post_ra>
// kernel: tpu_custom_call.1
= control target key start
LH: loop header
LB: loop body
LE: loop exit
PB: predicated region body
PF: predicated region fallthrough
CT: control target
= control target key end

     0   :  { %8 = vsyncpa [#allocation9], 0  ;;  %s337_s0 = inlined_call_operand.vmem [shape: s32[8,1], index: 0, kind: input, shape index: {}]   ;;  %s338_s1 = inlined_call_operand.vmem [shape: f32[8,32], index: 1, kind: input, shape index: {}]   ;;  %s339_s2 = inlined_call_operand.hbm [shape: f32[8,32], index: 2, kind: input, shape index: {}]   ;;  %s340_s3 = inlined_call_operand.hbm [shape: f32[1,8,128], index: 3, kind: output, shape index: {}]  }
   0x1   :  { %9 = vsyncpa [#allocation10], 0  ;;  %s266_s12 = smov [#allocation8]  }
   0x2   :  { %s20_s13 = sshll.u32 %s266_s12, 4  ;;  %s21_s13 = int_to_ptr.vmem [resolvable:$true] %s20_s13 }
   0x3   :  { %s230_s14 = scalar_lea.vmem %s21_s13, 128  ;;  %p235_p1 = scmp.lt.s32.totalorder %s21_s13, %s21_s13 }
   0x4   :  { %p231_p0 = scmp.ne.s32.totalorder %s21_s13, %s230_s14  ;;  %p236_p2 = scmp.lt.s32.totalorder %s230_s14, %s230_s14 }
   0x6   :  { %p237_p3 = por %p236_p2, %p235_p1 }
   0x8   :  { %p238_p4 = pnand %p237_p3, %p231_p0 }
   0xa   :  { %241 = shalt.err (!%p238_p4)
}
   0xb   :  { %23 = dma.hbm_to_vmem [thread:$0]  %s339_s2, 128, %s21_s13, [#allocation9]  }
   0xc   :  { %262 = dma.done.wait [#allocation9], 128  }
   0xd   :  { %263 = vsyncadd [#allocation9], 4294967168  ;;  %vm31_vm0 = vcmask 7168   ;;  %v267_v0 = vmov -inf   ;;  %vm50_vm1 = vcmask 261120   ;;  %v39_v1 = vld [vmem:[%s338_s1] sm:$0xff]  ;;  %v40_v16 = vlaneseq }
   0xe   :  { %32 = vst.msk [vmem:[#allocation2] sm:$0xff] %vm31_vm0, %v267_v0  ;;  %33 = vst.msk [vmem:[#allocation5] sm:$0xff] %vm31_vm0, %v267_v0  ;;  %v82_v2 = vld [vmem:[#allocation8] sm:$0xff]  ;;  %v51_v3 = vsel %vm50_vm1, %v39_v1, -inf  ;;  %v268_v5 = vmov 0   ;;  %v269_v6 = vmov 0.0  }
   0xf   :  { %52 = vmax.xlane.f32.xlu0 %v51_v3  ;;  %v84_v4 = vsel %vm50_vm1, %v82_v2, -inf  ;;  %208 = vset.pattern.permute.xlu1 %v268_v5  ;;  %34 = vst.msk [vmem:[#allocation3] sm:$0xff] %vm31_vm0, %v269_v6  ;;  %35 = vst.msk [vmem:[#allocation6] sm:$0xff] %vm31_vm0, %v269_v6  ;;  %v312_v7 = vld [vmem:[%s337_s0] sm:$0xff]  ;;  %v41_v18 = vand.u32 127, %v40_v16  ;;  %s270_s20 = smov [#allocation11]  }
  0x10   :  { %209 = vset.pattern.permute.xlu0 %v268_v5  ;;  %36 = vst.msk [vmem:[#allocation4] sm:$0xff] %vm31_vm0, %v269_v6  ;;  %37 = vst.msk [vmem:[#allocation7] sm:$0xff] %vm31_vm0, %v269_v6  ;;  %vm123_vm3 = vcmp.ne.s32.totalorder %v312_v7, 4294967196  ;;  %s187_s21 = sshll.u32 %s270_s20, 4  ;;  %s188_s21 = int_to_ptr.vmem [resolvable:$true] %s187_s21 }
  0x11   :  { %s242_s23 = scalar_lea.vmem %s188_s21, 128  ;;  %p247_p6 = scmp.lt.s32.totalorder %s188_s21, %s188_s21 }
  0x12   :  { %p243_p5 = scmp.ne.s32.totalorder %s188_s21, %s242_s23  ;;  %p248_p7 = scmp.lt.s32.totalorder %s242_s23, %s242_s23 }
  0x13   :  { %85 = vmax.xlane.f32.xlu0 %v84_v4  ;;  %v196_v4 = vsel %vm123_vm3, 1.0, %v269_v6 }
  0x14   :  { %p249_p8 = por %p248_p7, %p247_p6 }
  0x15   :  { %v49_v8 = vld [vmem:[#allocation2] sm:$0xff]  ;;  %v83_v11 = vld [vmem:[#allocation5] sm:$0xff] }
  0x16   :  { %v58_v39 = vld [vmem:[#allocation3] sm:$0xff]  ;;  %v91_v43 = vld [vmem:[#allocation6] sm:$0xff]  ;;  %p250_p9 = pnand %p249_p8, %p243_p5 }
  0x17   :  { %v106_v33 = vld [vmem:[#allocation7] sm:$0xff]  ;;  %v74_v48 = vld [vmem:[#allocation4] sm:$0xff] }
  0x29   :  { %46 = vperm.xlu0 %209, %v312_v7  }
  0x98   :  { %v53_v9 = vpop.xlane.xlu0 %52 }
  0x99   :  { %v54_v10 = vmax.f32 %v49_v8, %v53_v9 }
  0x9b   :  { %v55_v12 = vsub.f32 %v49_v8, %v54_v10  ;;  %81 = vst.msk [vmem:[#allocation2] sm:$0xff] %vm31_vm0, %v54_v10  ;;  %62 = vperm.xlu1 %208, %v54_v10   ;;  %v163_v8 = vsel %vm31_vm0, %v196_v4, 0.0 }
  0x9c   :  { %v86_v13 = vpop.xlane.xlu0 %85 }
  0x9d   :  { %v87_v14 = vmax.f32 %v83_v11, %v86_v13  ;;  %v56_v36 = vmul.f32 1.442695, %v55_v12 }
  0x9f   :  { %v88_v15 = vsub.f32 %v83_v11, %v87_v14  ;;  %113 = vst.msk [vmem:[#allocation5] sm:$0xff] %vm31_vm0, %v87_v14  ;;  %95 = vperm.xlu1 %208, %v87_v14  }
  0xa1   :  { %v89_v37 = vmul.f32 1.442695, %v88_v15 }
  0xa2   :  { %v125_v55 = vld [vmem:[#allocation2] sm:$0xff] }
  0xa4   :  { %v47_v17 = vpop.permute.xlu0 %46 }
  0xa5   :  { %vm48_vm2 = vcmp.eq.s32.totalorder %v41_v18, %v47_v17 }
  0xa6   :  { %v107_v19 = vsel %vm48_vm2, %v82_v2, 0.0  ;;  %v75_v30 = vsel %vm48_vm2, %v39_v1, 0.0  ;;  %v143_v61 = vld [vmem:[#allocation5] sm:$0xff] }
  0xa7   :  { %v108_v20 = vsel %vm50_vm1, %v107_v19, 0.0  ;;  %v76_v32 = vsel %vm50_vm1, %v75_v30, 0.0 }
  0xa8   :  { %109 = vadd.xlane.f32.xlu0 %v108_v20 }
 0x116   :  { %v63_v21 = vpop.permute.xlu1 %62 }
 0x117   :  { %v65_v22 = vsub.f32 %v39_v1, %v63_v21 }
 0x119   :  { %v66_v23 = vmul.f32 1.442695, %v65_v22 }
 0x11a   :  { %v96_v24 = vpop.permute.xlu1 %95 }
 0x11b   :  { %210 = vpow2.f32 %v66_v23  ;;  %v98_v25 = vsub.f32 %v82_v2, %v96_v24 }
 0x11d   :  { %v99_v26 = vmul.f32 1.442695, %v98_v25 }
 0x11f   :  { %212 = vpow2.f32 %v99_v26 }
 0x120   :  { %214 = vpow2.f32 %v56_v36 }
 0x121   :  { %216 = vpow2.f32 %v89_v37 }
 0x128   :  { %v211_v27 = vpop.eup %210 }
 0x129   :  { %v68_v28 = vsel %vm50_vm1, %v211_v27, 0.0 }
 0x12a   :  { %69 = vadd.xlane.f32.xlu1 %v68_v28 }
 0x12c   :  { %v213_v29 = vpop.eup %212 }
 0x12d   :  { %v101_v31 = vsel %vm50_vm1, %v213_v29, 0.0  ;;  %v215_v38 = vpop.eup %214  ;;  %v118_v29 = vshrl.u32 %v40_v16, 7 }
 0x12e   :  { %102 = vadd.xlane.f32.xlu1 %v101_v31  ;;  %v59_v40 = vmul.f32 %v215_v38, %v58_v39  ;;  %v217_v41 = vpop.eup %216 }
 0x12f   :  { %v92_v45 = vmul.f32 %v217_v41, %v91_v43  ;;  %vm174_vm4 = vcmp.eq.s32.totalorder %v118_v29, 1  ;;  %vm173_vm5 = vcmp.eq.s32.totalorder %v118_v29, 0 }
 0x131   :  { %v110_v34 = vpop.xlane.xlu0 %109 }
 0x132   :  { %77 = vadd.xlane.f32.xlu1 %v76_v32  ;;  %v111_v35 = vadd.f32 %v110_v34, %v106_v33 }
 0x134   :  { %112 = vst.msk [vmem:[#allocation7] sm:$0xff] %vm31_vm0, %v111_v35 }
 0x13b   :  { %v148_v1 = vld [vmem:[#allocation7] sm:$0xff] }
 0x1b3   :  { %v70_v42 = vpop.xlane.xlu1 %69 }
 0x1b4   :  { %v71_v44 = vadd.f32 %v70_v42, %v59_v40 }
 0x1b6   :  { %73 = vst.msk [vmem:[#allocation3] sm:$0xff] %vm31_vm0, %v71_v44 }
 0x1b7   :  { %v103_v46 = vpop.xlane.xlu1 %102 }
 0x1b8   :  { %v104_v47 = vadd.f32 %v103_v46, %v92_v45 }
 0x1ba   :  { %105 = vst.msk [vmem:[#allocation6] sm:$0xff] %vm31_vm0, %v104_v47 }
 0x1bb   :  { %v78_v49 = vpop.xlane.xlu1 %77 }
 0x1bc   :  { %v79_v50 = vadd.f32 %v78_v49, %v74_v48 }
 0x1bd   :  { %v126_v51 = vld [vmem:[#allocation3] sm:$0xff] }
 0x1be   :  { %80 = vst.msk [vmem:[#allocation4] sm:$0xff] %vm31_vm0, %v79_v50  ;;  %218 = vlog2.f32 %v126_v51 }
 0x1c1   :  { %v144_v52 = vld [vmem:[#allocation6] sm:$0xff] }
 0x1c2   :  { %220 = vlog2.f32 %v144_v52 }
 0x1c5   :  { %v130_v56 = vld [vmem:[#allocation4] sm:$0xff] }
 0x1cb   :  { %v219_v53 = vpop.eup %218 }
 0x1cc   :  { %v128_v54 = vmul.f32 0.6931472, %v219_v53 }
 0x1ce   :  { %v129_v57 = vadd.f32 %v128_v54, %v125_v55 }
 0x1cf   :  { %v221_v58 = vpop.eup %220 }
 0x1d0   :  { %v131_v59 = vsub.f32 %v129_v57, %v130_v56  ;;  %v146_v60 = vmul.f32 0.6931472, %v221_v58 }
 0x1d2   :  { %v132_v62 = vsel %vm123_vm3, %v131_v59, 0.0  ;;  %v147_v63 = vadd.f32 %v146_v60, %v143_v61 }
 0x1d3   :  { %v133_v0 = vsel %vm31_vm0, %v132_v62, 0.0 }
 0x1d4   :  { %134 = vadd.xlane.f32.xlu1 %v133_v0  ;;  %v149_v2 = vsub.f32 %v147_v63, %v148_v1 }
 0x1d6   :  { %v150_v3 = vsel %vm123_vm3, %v149_v2, 0.0 }
 0x1d7   :  { %v151_v5 = vsel %vm31_vm0, %v150_v3, 0.0 }
 0x1d8   :  { %152 = vadd.xlane.f32.xlu1 %v151_v5 }
 0x1dc   :  { %164 = vadd.xlane.f32.xlu1 %v163_v8 }
 0x25d   :  { %v135_v7 = vpop.xlane.xlu1 %134 }
 0x25e   :  { %v136_v9 = vrot.slane %v135_v7, 4 }
 0x260   :  { %v137_v10 = vadd.f32 %v136_v9, %v135_v7 }
 0x261   :  { %v153_v11 = vpop.xlane.xlu1 %152 }
 0x262   :  { %v138_v12 = vrot.slane %v137_v10, 2  ;;  %v154_v13 = vrot.slane %v153_v11, 4 }
 0x264   :  { %v155_v14 = vadd.f32 %v154_v13, %v153_v11  ;;  %v139_v15 = vadd.f32 %v138_v12, %v137_v10 }
 0x265   :  { %v165_v17 = vpop.xlane.xlu1 %164 }
 0x266   :  { %v156_v18 = vrot.slane %v155_v14, 2  ;;  %v166_v19 = vrot.slane %v165_v17, 4  ;;  %v140_v20 = vrot.slane %v139_v15, 1 }
 0x268   :  { %v167_v21 = vadd.f32 %v166_v19, %v165_v17  ;;  %v141_v6 = vadd.f32 %v140_v20, %v139_v15  ;;  %v157_v22 = vadd.f32 %v156_v18, %v155_v14 }
 0x26a   :  { %v168_v23 = vrot.slane %v167_v21, 2  ;;  %197 = vpush %v141_v6  ;;  %v158_v24 = vrot.slane %v157_v22, 1 }
 0x26c   :  { %v169_v25 = vadd.f32 %v168_v23, %v167_v21  ;;  %v159_v26 = vadd.f32 %v158_v24, %v157_v22 }
 0x26e   :  { %199 = vpush %v159_v26  ;;  %v170_v27 = vrot.slane %v169_v25, 1 }
 0x270   :  { %v171_v28 = vadd.f32 %v170_v27, %v169_v25 }
 0x272   :  { %201 = vpush %v171_v28 }
 0x29b   :  { %s198_s0 = spop %197 }
 0x29c   :  { %v178_v32 = vstv %s198_s0 }
 0x29f   :  { %s200_s19 = spop %199 }
 0x2a0   :  { %v175_v30 = vstv %s200_s19 }
 0x2a3   :  { %s202_s22 = spop %201 }
 0x2a4   :  { %v176_v31 = vstv %s202_s22 }
 0x2a5   :  { %v177_v33 = vsel %vm174_vm4, %v175_v30, %v176_v31 }
 0x2a6   :  { %v179_v34 = vsel %vm173_vm5, %v178_v32, %v177_v33 }
 0x2a7   :  { %180 = vst [vmem:[#allocation11] sm:$0xff] %v179_v34 }
 0x2a8   :  { %253 = shalt.err (!%p250_p9)
}
 0x2a9   :  { %190 = dma.vmem_to_hbm [thread:$0]  %s188_s21, 128, %s340_s3, [#allocation10]  }
 0x2aa   :  { %264 = dma.done.wait [#allocation10], 128  }
 0x2ab   :  { %265 = vsyncadd [#allocation10], 4294967168 }
 0x2ac   :  { %194 = vsyncpa [#allocation9], 1 }
 0x2ad   :  { %195 = vsyncpa [#allocation10], 1 }

</bundles_post_ra>
